<compile_context>
chip_gen: v7x
topology: tpu7x:2x2x1
jax: 0.10.0
libtpu: 0.0.40
codegen_flags: <defaults>
</compile_context>

<pallas_src>
import jax
import jax.numpy as jnp
from jax.experimental import pallas as pl
from jax.experimental.pallas import tpu as pltpu

K1, K2, KD = 9, 9, 3        # conv1 / conv2 / downsample kernel sizes
EPS = 1e-5                  # PyTorch BatchNorm eps


def _make_kernel(P, Wp, L, mxu_dtype):
    L1, L2 = L - 4, L - 2   # conv1 valid length / block output length

    def kernel(x_ref, w1d_ref, w2_ref, fw1_ref, fw2_ref, sb_ref,
               sel_ref, selt_ref, o_ref):
        NB, Cin, _ = x_ref.shape
        NBW = NB * Wp

        # ---- weights / per-channel constants (one DMA each per grid step) ----
        w1d = w1d_ref[...]            # (2P, K1*Cin)  [conv1 ; downsample@taps2..4]
        w2 = w2_ref[...]              # (P, K2*P)
        fw1 = fw1_ref[...]            # (P, P)
        fw2 = fw2_ref[...]            # (P, P)
        sel = sel_ref[...]            # (NBW, NS)  block-diagonal GAP selector
        sel_t = selt_ref[...]         # (NS, NBW)  its transpose (threshold bcast)
        sb = sb_ref[...]              # (P, 8) packed scale/bias columns
        s1, b1 = sb[:, 0:1], sb[:, 1:2]
        s2, b2 = sb[:, 2:3], sb[:, 3:4]
        fb1, fs = sb[:, 4:5], sb[:, 5:6]
        fbe, fb2 = sb[:, 6:7], sb[:, 7:8]

        # ---- per-sample lane masks over the packed width (built once) ----
        lane = jax.lax.broadcasted_iota(jnp.int32, (1, Wp), 1)
        m1 = (lane < L1).astype(jnp.float32)
        m2 = (lane < L2).astype(jnp.float32)
        mask1 = m1 if NB == 1 else jnp.concatenate([m1] * NB, axis=1)  # (1, NBW)
        mask2 = m2 if NB == 1 else jnp.concatenate([m2] * NB, axis=1)  # (1, NBW)

        # ---- pack all NB samples on the lane axis ----
        # x_n's data lives at lanes [2 + n*Wp, 2 + n*Wp + L); everything else
        # in its slot is zero, which doubles as conv padding / sample halo.
        zc = lambda w: jnp.zeros((Cin, w), mxu_dtype)
        pieces = [zc(2)]
        for n in range(NB):
            pieces.append(x_ref[n].astype(mxu_dtype))
            pieces.append(zc(Wp - L))
        pieces.append(zc(6))
        xe = jnp.concatenate(pieces, axis=1)                          # (Cin, NBW+8)

        # ---- conv1 (k=9, pad=2) + downsample (k=3, pad=0): one fused matmul ----
        a1 = jnp.concatenate([xe[:, k:k + NBW] for k in range(K1)], axis=0)
        big = jnp.dot(w1d, a1, preferred_element_type=jnp.float32)    # (2P, NBW)
        h1 = jnp.maximum(big[:P] * s1 + b1, 0.0) * mask1              # bn1 + relu
        res = big[P:2 * P]                                            # residual

        # ---- conv2 (k=9, pad=5) ----
        zp = lambda w: jnp.zeros((P, w), mxu_dtype)
        h1e = jnp.concatenate([zp(5), h1.astype(mxu_dtype), zp(3)], axis=1)
        a2 = jnp.concatenate([h1e[:, k:k + NBW] for k in range(K2)], axis=0)
        h2 = jnp.dot(w2, a2, preferred_element_type=jnp.float32)      # (P, NBW)
        h2 = h2 * s2 + b2                                             # bn2

        # ---- shrinkage: GAP(|h2|) -> FC -> BN -> ReLU -> FC -> sigmoid ----
        absm = jnp.abs(h2) * mask2
        avg = jnp.dot(absm, sel,
                      preferred_element_type=jnp.float32) * (1.0 / L2)  # (P, NS)
        z1 = jnp.dot(fw1, avg, preferred_element_type=jnp.float32) + fb1
        z1 = jnp.maximum(z1 * fs + fbe, 0.0)
        z2 = jax.nn.sigmoid(
            jnp.dot(fw2, z1, preferred_element_type=jnp.float32) + fb2)
        t = jnp.dot(avg * z2, sel_t,
                    preferred_element_type=jnp.float32)               # (P, NBW)

        shr = h2 + 0.5 * (jnp.sqrt((h2 - t) ** 2 + 0.003)
                          - jnp.sqrt((h2 + t) ** 2 + 0.003))

        # ---- residual add + final ReLU, per-sample unpadded store ----
        out = jnp.maximum(shr + res, 0.0)                             # (P, NBW)
        for n in range(NB):
            o_ref[n] = out[:, n * Wp:n * Wp + L2]

    return kernel


def basic_block_1x9(x, p, batch_per_step=None, mxu_dtype=jnp.bfloat16):
    """x: (N, Cin, L) float32, returns (N, P, L-2) float32."""
    N, Cin, L = x.shape
    P = p['w1'].shape[0]
    assert L >= 5, "BasicBlock1x9 kernel requires L >= 5"
    L2 = L - 2
    Wp = 128 * pl.cdiv(L + 4, 128)      # per-sample lane-aligned slot (>= L+2 halo)
    f32 = jnp.float32

    # Samples per grid step: amortize the ~0.35us/step pipeline overhead but
    # keep >= 2 grid steps whenever N >= 2 (both v7x TensorCores busy).
    if batch_per_step is None:
        nb = max(1, min(8, pl.cdiv(N, 2)))
    else:
        nb = max(1, int(batch_per_step))
    n_pad = pl.cdiv(N, nb) * nb          # batch padding (no silent nb->1 fallback)
    if n_pad != N:
        x = jnp.concatenate(
            [x, jnp.zeros((n_pad - N, Cin, L), x.dtype)], axis=0)

    def fold_bn(g, b, m, v):
        s = g / jnp.sqrt(v + EPS)
        return s, b - m * s

    s1, b1 = fold_bn(p['bn1_g'], p['bn1_b'], p['bn1_m'], p['bn1_v'])
    s2, b2 = fold_bn(p['bn2_g'], p['bn2_b'], p['bn2_m'], p['bn2_v'])
    fs, fbe = fold_bn(p['fbn_g'], p['fbn_b'], p['fbn_m'], p['fbn_v'])

    # Pack all per-channel vectors into one (P, 8) slab (single DMA).
    sb = jnp.stack([s1, b1, s2, b2, p['fc1_b'], fs, fbe, p['fc2_b']],
                   axis=1).astype(f32)

    # im2col weight layout: contraction index = k*Cin + c (tap axis off lanes).
    w1m = jnp.transpose(p['w1'], (0, 2, 1)).reshape(P, K1 * Cin).astype(f32)
    w2m = jnp.transpose(p['w2'], (0, 2, 1)).reshape(P, K2 * P).astype(mxu_dtype)
    # Downsample (k=3, pad=0) embedded at conv1 taps 2..4, stacked under w1m.
    wd_emb = jnp.zeros((P, K1, Cin), f32).at[:, 2:2 + KD, :].set(
        jnp.transpose(p['wd'], (0, 2, 1)).astype(f32)).reshape(P, K1 * Cin)
    w1d = jnp.concatenate([w1m, wd_emb], axis=0).astype(mxu_dtype)  # (2P, K1*Cin)

    # Block-diagonal selectors for per-sample GAP / threshold broadcast,
    # padded to >= 8 "sample" columns so the tiny dots keep MXU-friendly dims.
    NS = max(8, nb)
    sel_t = jnp.zeros((NS, nb * Wp), f32).at[:nb, :].set(
        jnp.repeat(jnp.eye(nb, dtype=f32), Wp, axis=1))              # (NS, nb*Wp)
    sel = sel_t.T                                                    # (nb*Wp, NS)

    kernel = _make_kernel(P, Wp, L, mxu_dtype)
    const = lambda shape: pl.BlockSpec(shape, lambda n: (0, 0))

    grid_spec = pltpu.PrefetchScalarGridSpec(
        num_scalar_prefetch=0,
        grid=(n_pad // nb,),
        in_specs=[
            pl.BlockSpec((nb, Cin, L), lambda n: (n, 0, 0)),   # x
            const((2 * P, K1 * Cin)),                          # conv1+downsample w
            const((P, K2 * P)),                                # conv2 w
            const((P, P)),                                     # fc1 w
            const((P, P)),                                     # fc2 w
            const((P, 8)),                                     # packed scale/bias
            const((nb * Wp, NS)),                              # GAP selector
            const((NS, nb * Wp)),                              # selector transpose
        ],
        out_specs=pl.BlockSpec((nb, P, L2), lambda n: (n, 0, 0)),
    )

    out = pl.pallas_call(
        kernel,
        out_shape=jax.ShapeDtypeStruct((n_pad, P, L2), f32),
        grid_spec=grid_spec,
        compiler_params=pltpu.CompilerParams(
            dimension_semantics=("parallel",),
            vmem_limit_bytes=48 * 1024 * 1024),
    )(x.astype(f32), w1d, w2m,
      p['fc1_w'].astype(f32), p['fc2_w'].astype(f32), sb, sel, sel_t)

    return out[:N] if n_pad != N else out


# ----------------------------- pure-JAX reference -----------------------------
def _conv1d(x, w, pad):
    return jax.lax.conv_general_dilated(
        x.astype(jnp.float32), w.astype(jnp.float32), window_strides=(1,),
        padding=[(pad, pad)], dimension_numbers=('NCH', 'OIH', 'NCH'),
        precision=jax.lax.Precision.HIGHEST)


def reference_forward(x, p):
    def bn(y, g, b, m, v):
        return ((y - m[None, :, None]) / jnp.sqrt(v[None, :, None] + EPS)
                * g[None, :, None] + b[None, :, None])

    h = _conv1d(x, p['w1'], 2)
    h = jnp.maximum(bn(h, p['bn1_g'], p['bn1_b'], p['bn1_m'], p['bn1_v']), 0.0)
    h = _conv1d(h, p['w2'], 5)
    h2 = bn(h, p['bn2_g'], p['bn2_b'], p['bn2_m'], p['bn2_v'])

    avg = jnp.mean(jnp.abs(h2), axis=2)                       # (N, P)
    z1 = avg @ p['fc1_w'].T + p['fc1_b']
    z1 = (z1 - p['fbn_m']) / jnp.sqrt(p['fbn_v'] + EPS) * p['fbn_g'] + p['fbn_b']
    z1 = jnp.maximum(z1, 0.0)
    z2 = jax.nn.sigmoid(z1 @ p['fc2_w'].T + p['fc2_b'])
    t = (avg * z2)[:, :, None]
    shr = h2 + 0.5 * (jnp.sqrt((h2 - t) ** 2 + 0.003)
                      - jnp.sqrt((h2 + t) ** 2 + 0.003))
    res = _conv1d(x, p['wd'], 0)                              # downsample
    return jnp.maximum(shr + res, 0.0)


if __name__ == "__main__":
    N, Cin, P, L = 4, 8, 8, 32
    key = jax.random.PRNGKey(0)
    ks = jax.random.split(key, 20)
    f32 = jnp.float32

    def rn(k, shape, scale=0.1):
        return (scale * jax.random.normal(k, shape)).astype(f32)

    p = {
        'w1':    rn(ks[0], (P, Cin, K1)),
        'bn1_g': (1.0 + 0.1 * jax.random.normal(ks[1], (P,))).astype(f32),
        'bn1_b': rn(ks[2], (P,)),
        'bn1_m': rn(ks[3], (P,)),
        'bn1_v': (0.5 + jax.random.uniform(ks[4], (P,))).astype(f32),
        'w2':    rn(ks[5], (P, P, K2)),
        'bn2_g': (1.0 + 0.1 * jax.random.normal(ks[6], (P,))).astype(f32),
        'bn2_b': rn(ks[7], (P,)),
        'bn2_m': rn(ks[8], (P,)),
        'bn2_v': (0.5 + jax.random.uniform(ks[9], (P,))).astype(f32),
        'fc1_w': rn(ks[10], (P, P), 0.3),
        'fc1_b': rn(ks[11], (P,)),
        'fbn_g': (1.0 + 0.1 * jax.random.normal(ks[12], (P,))).astype(f32),
        'fbn_b': rn(ks[13], (P,)),
        'fbn_m': rn(ks[14], (P,)),
        'fbn_v': (0.5 + jax.random.uniform(ks[15], (P,))).astype(f32),
        'fc2_w': rn(ks[16], (P, P), 0.3),
        'fc2_b': rn(ks[17], (P,)),
        'wd':    rn(ks[18], (P, Cin, KD)),
    }
    x = jax.random.normal(ks[19], (N, Cin, L), dtype=f32)

    out = basic_block_1x9(x, p)            # bf16 MXU operands (default)
    out = jax.block_until_ready(out)

    ref = reference_forward(x, p)
    assert out.shape == (N, P, L - 2), out.shape
    # Tolerance covers bf16 MXU-operand rounding vs the f32 XLA reference.
    max_err = float(jnp.max(jnp.abs(out - ref)))
    assert jnp.allclose(out, ref, atol=5e-2, rtol=5e-2), max_err
    print("KERNEL_OK")
</pallas_src>

<mosaic_0001>
module attributes {stable_mosaic.version = 11 : i64} {
  func.func @kernel(%arg0: i32, %arg1: memref<2x8x32xf32, #tpu.memory_space<vmem>>, %arg2: memref<16x72xbf16, #tpu.memory_space<vmem>>, %arg3: memref<8x72xbf16, #tpu.memory_space<vmem>>, %arg4: memref<8x8xf32, #tpu.memory_space<vmem>>, %arg5: memref<8x8xf32, #tpu.memory_space<vmem>>, %arg6: memref<8x8xf32, #tpu.memory_space<vmem>>, %arg7: memref<256x8xf32, #tpu.memory_space<vmem>>, %arg8: memref<8x256xf32, #tpu.memory_space<vmem>>, %arg9: memref<2x8x30xf32, #tpu.memory_space<vmem>>) attributes {dimension_semantics = [#tpu.dimension_semantics<parallel>], iteration_bounds = array<i64: 2>, scalar_prefetch = 0 : i64, scratch_operands = 0 : i64, tpu.core_type = #tpu.core_type<tc>, window_params = [{transform_indices = @transform_0, window_bounds = array<i64: 2, 8, 32>}, {pipeline_mode = #tpu.pipeline_mode<synchronous>, transform_indices = @transform_1, window_bounds = array<i64: 16, 72>}, {pipeline_mode = #tpu.pipeline_mode<synchronous>, transform_indices = @transform_2, window_bounds = array<i64: 8, 72>}, {pipeline_mode = #tpu.pipeline_mode<synchronous>, transform_indices = @transform_3, window_bounds = array<i64: 8, 8>}, {pipeline_mode = #tpu.pipeline_mode<synchronous>, transform_indices = @transform_4, window_bounds = array<i64: 8, 8>}, {pipeline_mode = #tpu.pipeline_mode<synchronous>, transform_indices = @transform_5, window_bounds = array<i64: 8, 8>}, {pipeline_mode = #tpu.pipeline_mode<synchronous>, transform_indices = @transform_6, window_bounds = array<i64: 256, 8>}, {pipeline_mode = #tpu.pipeline_mode<synchronous>, transform_indices = @transform_7, window_bounds = array<i64: 8, 256>}, {transform_indices = @transform_8, window_bounds = array<i64: 2, 8, 30>}]} {
    %c0 = arith.constant 0 : index
    %c0_0 = arith.constant 0 : index
    %0 = vector.load %arg2[%c0, %c0_0] : memref<16x72xbf16, #tpu.memory_space<vmem>>, vector<16x72xbf16>
    %c0_1 = arith.constant 0 : index
    %c0_2 = arith.constant 0 : index
    %1 = vector.load %arg3[%c0_1, %c0_2] : memref<8x72xbf16, #tpu.memory_space<vmem>>, vector<8x72xbf16>
    %c0_3 = arith.constant 0 : index
    %c0_4 = arith.constant 0 : index
    %2 = vector.load %arg4[%c0_3, %c0_4] : memref<8x8xf32, #tpu.memory_space<vmem>>, vector<8x8xf32>
    %c0_5 = arith.constant 0 : index
    %c0_6 = arith.constant 0 : index
    %3 = vector.load %arg5[%c0_5, %c0_6] : memref<8x8xf32, #tpu.memory_space<vmem>>, vector<8x8xf32>
    %c0_7 = arith.constant 0 : index
    %c0_8 = arith.constant 0 : index
    %4 = vector.load %arg7[%c0_7, %c0_8] : memref<256x8xf32, #tpu.memory_space<vmem>>, vector<256x8xf32>
    %c0_9 = arith.constant 0 : index
    %c0_10 = arith.constant 0 : index
    %5 = vector.load %arg8[%c0_9, %c0_10] : memref<8x256xf32, #tpu.memory_space<vmem>>, vector<8x256xf32>
    %c0_11 = arith.constant 0 : index
    %c0_12 = arith.constant 0 : index
    %6 = vector.load %arg6[%c0_11, %c0_12] : memref<8x8xf32, #tpu.memory_space<vmem>>, vector<8x8xf32>
    %7 = vector.extract_strided_slice %6 {offsets = [0, 0], sizes = [8, 1], strides = [1, 1]} : vector<8x8xf32> to vector<8x1xf32>
    %8 = vector.extract_strided_slice %6 {offsets = [0, 1], sizes = [8, 1], strides = [1, 1]} : vector<8x8xf32> to vector<8x1xf32>
    %9 = vector.extract_strided_slice %6 {offsets = [0, 2], sizes = [8, 1], strides = [1, 1]} : vector<8x8xf32> to vector<8x1xf32>
    %10 = vector.extract_strided_slice %6 {offsets = [0, 3], sizes = [8, 1], strides = [1, 1]} : vector<8x8xf32> to vector<8x1xf32>
    %11 = vector.extract_strided_slice %6 {offsets = [0, 4], sizes = [8, 1], strides = [1, 1]} : vector<8x8xf32> to vector<8x1xf32>
    %12 = vector.extract_strided_slice %6 {offsets = [0, 5], sizes = [8, 1], strides = [1, 1]} : vector<8x8xf32> to vector<8x1xf32>
    %13 = vector.extract_strided_slice %6 {offsets = [0, 6], sizes = [8, 1], strides = [1, 1]} : vector<8x8xf32> to vector<8x1xf32>
    %14 = vector.extract_strided_slice %6 {offsets = [0, 7], sizes = [8, 1], strides = [1, 1]} : vector<8x8xf32> to vector<8x1xf32>
    %15 = tpu.iota {dimensions = array<i32: 1>} : vector<1x128xi32>
    %c28_i32 = arith.constant 28 : i32
    %16 = vector.broadcast %c28_i32 : i32 to vector<1x128xi32>
    %17 = arith.cmpi slt, %15, %16 : vector<1x128xi32>
    %18 = arith.extui %17 : vector<1x128xi1> to vector<1x128xi32>
    %19 = arith.sitofp %18 : vector<1x128xi32> to vector<1x128xf32>
    %c30_i32 = arith.constant 30 : i32
    %20 = vector.broadcast %c30_i32 : i32 to vector<1x128xi32>
    %21 = arith.cmpi slt, %15, %20 : vector<1x128xi32>
    %22 = arith.extui %21 : vector<1x128xi1> to vector<1x128xi32>
    %23 = arith.sitofp %22 : vector<1x128xi32> to vector<1x128xf32>
    %24 = tpu.concatenate %19, %19 in 1 : vector<1x128xf32>, vector<1x128xf32> -> vector<1x256xf32>
    %25 = tpu.concatenate %23, %23 in 1 : vector<1x128xf32>, vector<1x128xf32> -> vector<1x256xf32>
    %cst = arith.constant 0.000000e+00 : bf16
    %26 = vector.broadcast %cst : bf16 to vector<8x2xbf16>
    %c0_13 = arith.constant 0 : index
    %c0_14 = arith.constant 0 : index
    %c0_15 = arith.constant 0 : index
    %27 = vector.load %arg1[%c0_13, %c0_14, %c0_15] : memref<2x8x32xf32, #tpu.memory_space<vmem>>, vector<1x8x32xf32>
    %28 = vector.shape_cast %27 : vector<1x8x32xf32> to vector<8x32xf32>
    %29 = arith.truncf %28 : vector<8x32xf32> to vector<8x32xbf16>
    %cst_16 = arith.constant 0.000000e+00 : bf16
    %30 = vector.broadcast %cst_16 : bf16 to vector<8x96xbf16>
    %c1 = arith.constant 1 : index
    %c0_17 = arith.constant 0 : index
    %c0_18 = arith.constant 0 : index
    %31 = vector.load %arg1[%c1, %c0_17, %c0_18] : memref<2x8x32xf32, #tpu.memory_space<vmem>>, vector<1x8x32xf32>
    %32 = vector.shape_cast %31 : vector<1x8x32xf32> to vector<8x32xf32>
    %33 = arith.truncf %32 : vector<8x32xf32> to vector<8x32xbf16>
    %cst_19 = arith.constant 0.000000e+00 : bf16
    %34 = vector.broadcast %cst_19 : bf16 to vector<8x96xbf16>
    %cst_20 = arith.constant 0.000000e+00 : bf16
    %35 = vector.broadcast %cst_20 : bf16 to vector<8x6xbf16>
    %36 = tpu.concatenate %26, %29, %30, %33, %34, %35 in 1 : vector<8x2xbf16>, vector<8x32xbf16>, vector<8x96xbf16>, vector<8x32xbf16>, vector<8x96xbf16>, vector<8x6xbf16> -> vector<8x264xbf16>
    %37 = vector.extract_strided_slice %36 {offsets = [0, 0], sizes = [8, 256], strides = [1, 1]} : vector<8x264xbf16> to vector<8x256xbf16>
    %38 = vector.extract_strided_slice %36 {offsets = [0, 1], sizes = [8, 256], strides = [1, 1]} : vector<8x264xbf16> to vector<8x256xbf16>
    %39 = vector.extract_strided_slice %36 {offsets = [0, 2], sizes = [8, 256], strides = [1, 1]} : vector<8x264xbf16> to vector<8x256xbf16>
    %40 = vector.extract_strided_slice %36 {offsets = [0, 3], sizes = [8, 256], strides = [1, 1]} : vector<8x264xbf16> to vector<8x256xbf16>
    %41 = vector.extract_strided_slice %36 {offsets = [0, 4], sizes = [8, 256], strides = [1, 1]} : vector<8x264xbf16> to vector<8x256xbf16>
    %42 = vector.extract_strided_slice %36 {offsets = [0, 5], sizes = [8, 256], strides = [1, 1]} : vector<8x264xbf16> to vector<8x256xbf16>
    %43 = vector.extract_strided_slice %36 {offsets = [0, 6], sizes = [8, 256], strides = [1, 1]} : vector<8x264xbf16> to vector<8x256xbf16>
    %44 = vector.extract_strided_slice %36 {offsets = [0, 7], sizes = [8, 256], strides = [1, 1]} : vector<8x264xbf16> to vector<8x256xbf16>
    %45 = vector.extract_strided_slice %36 {offsets = [0, 8], sizes = [8, 256], strides = [1, 1]} : vector<8x264xbf16> to vector<8x256xbf16>
    %46 = tpu.concatenate %37, %38, %39, %40, %41, %42, %43, %44, %45 in 0 : vector<8x256xbf16>, vector<8x256xbf16>, vector<8x256xbf16>, vector<8x256xbf16>, vector<8x256xbf16>, vector<8x256xbf16>, vector<8x256xbf16>, vector<8x256xbf16>, vector<8x256xbf16> -> vector<72x256xbf16>
    %cst_21 = arith.constant dense<0.000000e+00> : vector<16x256xf32>
    %47 = tpu.matmul %0, %46, %cst_21 {dimension_numbers = #tpu.dot_dimension_numbers<[1], [0], [0], [1], [0, 0, 1, 1], [], []>} : vector<16x72xbf16>, vector<72x256xbf16>, vector<16x256xf32> -> vector<16x256xf32>
    %48 = vector.extract_strided_slice %47 {offsets = [0, 0], sizes = [8, 256], strides = [1, 1]} : vector<16x256xf32> to vector<8x256xf32>
    %49 = vector.broadcast %7 : vector<8x1xf32> to vector<8x256xf32>
    %50 = arith.mulf %48, %49 : vector<8x256xf32>
    %51 = vector.broadcast %8 : vector<8x1xf32> to vector<8x256xf32>
    %52 = arith.addf %50, %51 : vector<8x256xf32>
    %cst_22 = arith.constant 0.000000e+00 : f32
    %53 = vector.broadcast %cst_22 : f32 to vector<8x256xf32>
    %54 = arith.maximumf %52, %53 : vector<8x256xf32>
    %55 = vector.broadcast %24 : vector<1x256xf32> to vector<8x256xf32>
    %56 = arith.mulf %54, %55 : vector<8x256xf32>
    %57 = vector.extract_strided_slice %47 {offsets = [8, 0], sizes = [8, 256], strides = [1, 1]} : vector<16x256xf32> to vector<8x256xf32>
    %cst_23 = arith.constant 0.000000e+00 : bf16
    %58 = vector.broadcast %cst_23 : bf16 to vector<8x5xbf16>
    %59 = arith.truncf %56 : vector<8x256xf32> to vector<8x256xbf16>
    %cst_24 = arith.constant 0.000000e+00 : bf16
    %60 = vector.broadcast %cst_24 : bf16 to vector<8x3xbf16>
    %61 = tpu.concatenate %58, %59, %60 in 1 : vector<8x5xbf16>, vector<8x256xbf16>, vector<8x3xbf16> -> vector<8x264xbf16>
    %62 = vector.extract_strided_slice %61 {offsets = [0, 0], sizes = [8, 256], strides = [1, 1]} : vector<8x264xbf16> to vector<8x256xbf16>
    %63 = vector.extract_strided_slice %61 {offsets = [0, 1], sizes = [8, 256], strides = [1, 1]} : vector<8x264xbf16> to vector<8x256xbf16>
    %64 = vector.extract_strided_slice %61 {offsets = [0, 2], sizes = [8, 256], strides = [1, 1]} : vector<8x264xbf16> to vector<8x256xbf16>
    %65 = vector.extract_strided_slice %61 {offsets = [0, 3], sizes = [8, 256], strides = [1, 1]} : vector<8x264xbf16> to vector<8x256xbf16>
    %66 = vector.extract_strided_slice %61 {offsets = [0, 4], sizes = [8, 256], strides = [1, 1]} : vector<8x264xbf16> to vector<8x256xbf16>
    %67 = vector.extract_strided_slice %61 {offsets = [0, 5], sizes = [8, 256], strides = [1, 1]} : vector<8x264xbf16> to vector<8x256xbf16>
    %68 = vector.extract_strided_slice %61 {offsets = [0, 6], sizes = [8, 256], strides = [1, 1]} : vector<8x264xbf16> to vector<8x256xbf16>
    %69 = vector.extract_strided_slice %61 {offsets = [0, 7], sizes = [8, 256], strides = [1, 1]} : vector<8x264xbf16> to vector<8x256xbf16>
    %70 = vector.extract_strided_slice %61 {offsets = [0, 8], sizes = [8, 256], strides = [1, 1]} : vector<8x264xbf16> to vector<8x256xbf16>
    %71 = tpu.concatenate %62, %63, %64, %65, %66, %67, %68, %69, %70 in 0 : vector<8x256xbf16>, vector<8x256xbf16>, vector<8x256xbf16>, vector<8x256xbf16>, vector<8x256xbf16>, vector<8x256xbf16>, vector<8x256xbf16>, vector<8x256xbf16>, vector<8x256xbf16> -> vector<72x256xbf16>
    %cst_25 = arith.constant dense<0.000000e+00> : vector<8x256xf32>
    %72 = tpu.matmul %1, %71, %cst_25 {dimension_numbers = #tpu.dot_dimension_numbers<[1], [0], [0], [1], [0, 0, 1, 1], [], []>} : vector<8x72xbf16>, vector<72x256xbf16>, vector<8x256xf32> -> vector<8x256xf32>
    %73 = vector.broadcast %9 : vector<8x1xf32> to vector<8x256xf32>
    %74 = arith.mulf %72, %73 : vector<8x256xf32>
    %75 = vector.broadcast %10 : vector<8x1xf32> to vector<8x256xf32>
    %76 = arith.addf %74, %75 : vector<8x256xf32>
    %77 = math.absf %76 : vector<8x256xf32>
    %78 = vector.broadcast %25 : vector<1x256xf32> to vector<8x256xf32>
    %79 = arith.mulf %77, %78 : vector<8x256xf32>
    %cst_26 = arith.constant dense<0.000000e+00> : vector<8x8xf32>
    %80 = tpu.matmul %79, %4, %cst_26 {dimension_numbers = #tpu.dot_dimension_numbers<[1], [0], [0], [1], [0, 0, 1, 1], [], []>} : vector<8x256xf32>, vector<256x8xf32>, vector<8x8xf32> -> vector<8x8xf32>
    %cst_27 = arith.constant 0.0333333351 : f32
    %81 = vector.broadcast %cst_27 : f32 to vector<8x8xf32>
    %82 = arith.mulf %80, %81 : vector<8x8xf32>
    %cst_28 = arith.constant dense<0.000000e+00> : vector<8x8xf32>
    %83 = tpu.matmul %2, %82, %cst_28 {dimension_numbers = #tpu.dot_dimension_numbers<[1], [0], [0], [1], [0, 0, 1, 1], [], []>} : vector<8x8xf32>, vector<8x8xf32>, vector<8x8xf32> -> vector<8x8xf32>
    %84 = vector.broadcast %11 : vector<8x1xf32> to vector<8x8xf32>
    %85 = arith.addf %83, %84 : vector<8x8xf32>
    %86 = vector.broadcast %12 : vector<8x1xf32> to vector<8x8xf32>
    %87 = arith.mulf %85, %86 : vector<8x8xf32>
    %88 = vector.broadcast %13 : vector<8x1xf32> to vector<8x8xf32>
    %89 = arith.addf %87, %88 : vector<8x8xf32>
    %cst_29 = arith.constant 0.000000e+00 : f32
    %90 = vector.broadcast %cst_29 : f32 to vector<8x8xf32>
    %91 = arith.maximumf %89, %90 : vector<8x8xf32>
    %cst_30 = arith.constant dense<0.000000e+00> : vector<8x8xf32>
    %92 = tpu.matmul %3, %91, %cst_30 {dimension_numbers = #tpu.dot_dimension_numbers<[1], [0], [0], [1], [0, 0, 1, 1], [], []>} : vector<8x8xf32>, vector<8x8xf32>, vector<8x8xf32> -> vector<8x8xf32>
    %93 = vector.broadcast %14 : vector<8x1xf32> to vector<8x8xf32>
    %94 = arith.addf %92, %93 : vector<8x8xf32>
    %95 = arith.negf %94 : vector<8x8xf32>
    %96 = math.exp %95 : vector<8x8xf32>
    %cst_31 = arith.constant 1.000000e+00 : f32
    %97 = vector.broadcast %cst_31 : f32 to vector<8x8xf32>
    %98 = arith.addf %97, %96 : vector<8x8xf32>
    %99 = arith.divf %97, %98 : vector<8x8xf32>
    %100 = arith.mulf %82, %99 : vector<8x8xf32>
    %cst_32 = arith.constant dense<0.000000e+00> : vector<8x256xf32>
    %101 = tpu.matmul %100, %5, %cst_32 {dimension_numbers = #tpu.dot_dimension_numbers<[1], [0], [0], [1], [0, 0, 1, 1], [], []>} : vector<8x8xf32>, vector<8x256xf32>, vector<8x256xf32> -> vector<8x256xf32>
    %102 = arith.subf %76, %101 : vector<8x256xf32>
    %103 = arith.mulf %102, %102 : vector<8x256xf32>
    %cst_33 = arith.constant 3.000000e-03 : f32
    %104 = vector.broadcast %cst_33 : f32 to vector<8x256xf32>
    %105 = arith.addf %103, %104 : vector<8x256xf32>
    %106 = math.sqrt %105 : vector<8x256xf32>
    %107 = arith.addf %76, %101 : vector<8x256xf32>
    %108 = arith.mulf %107, %107 : vector<8x256xf32>
    %cst_34 = arith.constant 3.000000e-03 : f32
    %109 = vector.broadcast %cst_34 : f32 to vector<8x256xf32>
    %110 = arith.addf %108, %109 : vector<8x256xf32>
    %111 = math.sqrt %110 : vector<8x256xf32>
    %112 = arith.subf %106, %111 : vector<8x256xf32>
    %cst_35 = arith.constant 5.000000e-01 : f32
    %113 = vector.broadcast %cst_35 : f32 to vector<8x256xf32>
    %114 = arith.mulf %113, %112 : vector<8x256xf32>
    %115 = arith.addf %76, %114 : vector<8x256xf32>
    %116 = arith.addf %115, %57 : vector<8x256xf32>
    %cst_36 = arith.constant 0.000000e+00 : f32
    %117 = vector.broadcast %cst_36 : f32 to vector<8x256xf32>
    %118 = arith.maximumf %116, %117 : vector<8x256xf32>
    %119 = vector.extract_strided_slice %118 {offsets = [0, 0], sizes = [8, 30], strides = [1, 1]} : vector<8x256xf32> to vector<8x30xf32>
    %c0_37 = arith.constant 0 : index
    %c0_38 = arith.constant 0 : index
    %c0_39 = arith.constant 0 : index
    %120 = vector.load %arg9[%c0_37, %c0_38, %c0_39] : memref<2x8x30xf32, #tpu.memory_space<vmem>>, vector<1x8x30xf32>
    %121 = vector.shape_cast %120 : vector<1x8x30xf32> to vector<8x30xf32>
    %122 = vector.shape_cast %119 : vector<8x30xf32> to vector<1x8x30xf32>
    tpu.vector_store %arg9[%c0_37, %c0_38, %c0_39], %122 {strides = array<i32>} : memref<2x8x30xf32, #tpu.memory_space<vmem>>, vector<1x8x30xf32>,
    %123 = vector.extract_strided_slice %118 {offsets = [0, 128], sizes = [8, 30], strides = [1, 1]} : vector<8x256xf32> to vector<8x30xf32>
    %c1_40 = arith.constant 1 : index
    %c0_41 = arith.constant 0 : index
    %c0_42 = arith.constant 0 : index
    %124 = vector.load %arg9[%c1_40, %c0_41, %c0_42] : memref<2x8x30xf32, #tpu.memory_space<vmem>>, vector<1x8x30xf32>
    %125 = vector.shape_cast %124 : vector<1x8x30xf32> to vector<8x30xf32>
    %126 = vector.shape_cast %123 : vector<8x30xf32> to vector<1x8x30xf32>
    tpu.vector_store %arg9[%c1_40, %c0_41, %c0_42], %126 {strides = array<i32>} : memref<2x8x30xf32, #tpu.memory_space<vmem>>, vector<1x8x30xf32>,
    return
  }
  func.func @transform_0(%arg0: i32) -> (i32, i32, i32) {
    %c0_i32 = arith.constant 0 : i32
    %c0_i32_0 = arith.constant 0 : i32
    %c0_i32_1 = arith.constant 0 : i32
    return %arg0, %c0_i32, %c0_i32_0 : i32, i32, i32
  }
  func.func @transform_1(%arg0: i32) -> (i32, i32) {
    %c0_i32 = arith.constant 0 : i32
    %c0_i32_0 = arith.constant 0 : i32
    %c0_i32_1 = arith.constant 0 : i32
    return %c0_i32, %c0_i32_0 : i32, i32
  }
  func.func @transform_2(%arg0: i32) -> (i32, i32) {
    %c0_i32 = arith.constant 0 : i32
    %c0_i32_0 = arith.constant 0 : i32
    %c0_i32_1 = arith.constant 0 : i32
    return %c0_i32, %c0_i32_0 : i32, i32
  }
  func.func @transform_3(%arg0: i32) -> (i32, i32) {
    %c0_i32 = arith.constant 0 : i32
    %c0_i32_0 = arith.constant 0 : i32
    %c0_i32_1 = arith.constant 0 : i32
    return %c0_i32, %c0_i32_0 : i32, i32
  }
  func.func @transform_4(%arg0: i32) -> (i32, i32) {
    %c0_i32 = arith.constant 0 : i32
    %c0_i32_0 = arith.constant 0 : i32
    %c0_i32_1 = arith.constant 0 : i32
    return %c0_i32, %c0_i32_0 : i32, i32
  }
  func.func @transform_5(%arg0: i32) -> (i32, i32) {
    %c0_i32 = arith.constant 0 : i32
    %c0_i32_0 = arith.constant 0 : i32
    %c0_i32_1 = arith.constant 0 : i32
    return %c0_i32, %c0_i32_0 : i32, i32
  }
  func.func @transform_6(%arg0: i32) -> (i32, i32) {
    %c0_i32 = arith.constant 0 : i32
    %c0_i32_0 = arith.constant 0 : i32
    %c0_i32_1 = arith.constant 0 : i32
    return %c0_i32, %c0_i32_0 : i32, i32
  }
  func.func @transform_7(%arg0: i32) -> (i32, i32) {
    %c0_i32 = arith.constant 0 : i32
    %c0_i32_0 = arith.constant 0 : i32
    %c0_i32_1 = arith.constant 0 : i32
    return %c0_i32, %c0_i32_0 : i32, i32
  }
  func.func @transform_8(%arg0: i32) -> (i32, i32, i32) {
    %c0_i32 = arith.constant 0 : i32
    %c0_i32_0 = arith.constant 0 : i32
    %c0_i32_1 = arith.constant 0 : i32
    return %arg0, %c0_i32, %c0_i32_0 : i32, i32, i32
  }
}

</mosaic_0001>

<bundles_post_ra>
// kernel: tpu_custom_call.1
= control target key start
LH: loop header
LB: loop body
LE: loop exit
PB: predicated region body
PF: predicated region fallthrough
CT: control target
= control target key end

     0   :  { %13 = vsyncpa [#allocation3], 0  ;;  %s1912_s0 = inlined_call_operand.vmem [shape: f32[4,8,32], index: 0, kind: input, shape index: {}]   ;;  %s1913_s1 = inlined_call_operand.vmem [shape: bf16[16,72], index: 1, kind: input, shape index: {}]   ;;  %s1914_s2 = inlined_call_operand.vmem [shape: bf16[8,72], index: 2, kind: input, shape index: {}]   ;;  %s1915_s3 = inlined_call_operand.vmem [shape: f32[8,8], index: 3, kind: input, shape index: {}]   ;;  %s1916_s4 = inlined_call_operand.vmem [shape: f32[8,8], index: 4, kind: input, shape index: {}]   ;;  %s1917_s5 = inlined_call_operand.vmem [shape: f32[8,8], index: 5, kind: input, shape index: {}]   ;;  %s1918_s6 = inlined_call_operand.vmem [shape: f32[256,8], index: 6, kind: input, shape index: {}]   ;;  %s1919_s7 = inlined_call_operand.vmem [shape: f32[8,256], index: 7, kind: input, shape index: {}]   ;;  %s1920_s8 = inlined_call_operand.hbm [shape: f32[4,8,30], index: 8, kind: output, shape index: {}]  }
   0x1   :  { %15 = vsyncpa [#allocation3 + $0x1], 0  ;;  %s1519_s27 = smov 0   ;;  %s1521_s28 = smov 0  }
   0x2   :  { %s1523_s29 = smov 0   ;;  %s1525_s30 = smov 0  }
   0x3 LB: > { %s1540_s9 = sadd.s32 4294967295, %s1449_s30   ;;  %s1197_s10 = sadd.s32 4294967294, %s1449_s30   ;;  %s1449_s30 = sphi %s1525_s30, %s1926_s30   ;;  %s1445_s29 = sphi %s1523_s29, %s1925_s29   ;;  %s1441_s28 = sphi %s1521_s28, %s1924_s28   ;;  %s1437_s27 = sphi %s1519_s27, %s1923_s27  }
   0x4   : > { %s1544_s11 = sadd.s32 1, %s1449_s30   ;;  %s201_s12 = sadd.s32 1, %s1445_s29 }
   0x5   : > { %s198_s13 = ssub.s32 %s1449_s30, %s1544_s11  ;;  %p211_p0 = scmp.ne.s32.totalorder %s1445_s29, %s1441_s28 }
   0x6   : > { %p199_p1 = scmp.eq.s32.totalorder %s198_s13, 0  ;;  %p212_p2 = scmp.eq.s32.totalorder %s1540_s9, 1 }
   0x7   : > { %p217_p3 = scmp.ne.s32.totalorder %s1441_s28, %s1437_s27  ;;  %p218_p4 = scmp.eq.s32.totalorder %s1197_s10, 1 }
   0x8   : > { %s1555_s14 = scalar_select %p199_p1, %s1445_s29, %s201_s12  }
   0x9   : > { %p1557_p5 = por %p212_p2, %p211_p0  ;;  %p1561_p6 = por %p218_p4, %p217_p3 }
   0xa   : > { %p1200_p7 = scmp.ge.s32.totalorder %s1449_s30, 1  ;;  %p266_p8 = scmp.lt.s32.totalorder %s1449_s30, 3 }
   0xc   : > { %p267_p9 = pnand %p1200_p7, %p266_p8 }
   0xd   : > { %s1202_s17 = sshll.u32 (!%p267_p9), %s1540_s9, 1  ;;  %v1451_v0 = vmov (!%p267_p9), 0   ;;  %s1452_s19 = smov (!%p267_p9), 127   ;;  %vm367_vm0 = vcmask (!%p267_p9), 15360   ;;  %vm371_vm1 = vcmask (!%p267_p9), 277504   ;;  %v1596_v14 = vld [vmem:[%s1917_s5] sm:$0xff] (!%p267_p9) }
   0xe   : > { %270 = sbr.rel (%p267_p9) target bundleno = 1975 (0x7b7), region = 52  ;;  %p301_p10 = scmp.lt.s32.totalorder (!%p267_p9), %s1202_s17, 3  ;;  %532 = vmatprep.mubr.bf16.mxu0 (!%p267_p9), %v1451_v0  ;;  %1365 = vset.pattern.permute.xlu0 (!%p267_p9), %v1451_v0  ;;  %v381_v1 = vrot.slane (!%p267_p9), %v1451_v0, 4  ;;  %v1461_v15 = vmov (!%p267_p9), 1   ;;  %vm388_vm2 = vcmask (!%p267_p9), 1039360   ;;  %vm454_vm3 = vcmask (!%p267_p9), 1043456  }
   0xf   : > { %720 = vmatprep.mubr.bf16.mxu1 (!%p267_p9), %v1451_v0  ;;  %s1453_s23 = smov (!%p267_p9), 2   ;;  %s1454_s24 = smov (!%p267_p9), 126   ;;  %1366 = vset.pattern.permute.xlu1 (!%p267_p9), %v1461_v15  ;;  %vm397_vm4 = vcmask (!%p267_p9), 1031168   ;;  %vm406_vm5 = vcmask (!%p267_p9), 1022976   ;;  %vm415_vm6 = vcmask (!%p267_p9), 1014784   ;;  %vm424_vm7 = vcmask (!%p267_p9), 1006592  }
  0x10   : > { %386 = vrot.lane.b32.xlu1 (!%p267_p9), %v381_v1, %s1452_s19  ;;  %s1455_s25 = smov (!%p267_p9), 125   ;;  %s1456_s26 = smov (!%p267_p9), 124   ;;  %vm433_vm8 = vcmask (!%p267_p9), 998400   ;;  %vm442_vm9 = vcmask (!%p267_p9), 990208   ;;  %vm451_vm10 = vcmask (!%p267_p9), 982016   ;;  %vm490_vm11 = vcmask (!%p267_p9), 588800  }
  0x11   : > { %s1457_s10 = smov (!%p267_p9), 123   ;;  %s1458_s12 = smov (!%p267_p9), 122   ;;  %vm572_vm13 = vcmask (!%p267_p9), 39936   ;;  %vm1466_vm15 = vmmov (!%p267_p9), 0  }
  0x12   : > { %s1459_s13 = smov (!%p267_p9), 121   ;;  %s1471_s21 = smov (!%p267_p9), [#allocation2]  }
  0x15   : > { %s1928_s17 = smov (!%p301_p10, %s1202_s17), 3 }
  0x16   : > { %s1203_s18 = sshll.u32 %s1928_s17, 3  ;;  %s1460_s17 = smov 120  }
  0x17   : > { %s304_s22 = scalar_lea.vmem %s1912_s0, %s1203_s18 }
  0x18   : > { %v1206_v2 = vld [vmem:[%s304_s22 + $0x8] sm:$0xff]  ;;  %v356_v3 = vld [vmem:[%s304_s22] sm:$0xff]  ;;  %s1391_s22 = sshll.u32 %s1471_s21, 4  ;;  %s1392_s22 = int_to_ptr.vmem [resolvable:$false] %s1391_s22 }
  0x19   : > { %v360_v4 = vpack.c.bf16 %v1206_v2, %v1206_v2  ;;  %v357_v5 = vpack.c.bf16 %v356_v3, %v356_v3  ;;  %v348_v2 = vlaneseq }
  0x1b   : > { %365 = vrot.lane.b32.xlu0 %v360_v4, %s1453_s23  ;;  %v1632_v3 = vand.u32 127, %v348_v2  ;;  %v1634_v4 = vshrl.u32 %v348_v2, 7  ;;  %v340_v2 = vld [vmem:[%s1918_s6 + $0xd8] sm:$0xff] }
  0x1d   : > { %vm350_vm12 = vcmp.lt.s32.totalorder %v1632_v3, 28  ;;  %vm353_vm14 = vcmp.lt.s32.totalorder %v1632_v3, 30 }
  0x1f   : > { %362 = vrot.lane.b32.xlu0 %v357_v5, %s1453_s23  ;;  %s1463_s23 = smov 5  }
  0x23   : > { %395 = vrot.lane.b32.xlu0 %v1451_v0, %s1454_s24 }
  0x27   : > { %404 = vrot.lane.b32.xlu0 %v381_v1, %s1455_s25 }
  0x2b   : > { %413 = vrot.lane.b32.xlu0 %v1451_v0, %s1456_s26 }
  0x2f   : > { %422 = vrot.lane.b32.xlu0 %v381_v1, %s1457_s10 }
  0x33   : > { %431 = vrot.lane.b32.xlu0 %v1451_v0, %s1458_s12 }
  0x37   : > { %440 = vrot.lane.b32.xlu0 %v381_v1, %s1459_s13  ;;  %v1374_v1 = vld [vmem:[%s1913_s1] sm:$0xff]  }
  0x82   : > { %v387_v19 = vpop.permute.xlu1 %386 }
  0x8d   : > { %v366_v6 = vpop.permute.xlu0 %365 }
  0x8e   : > { %v374_v7 = vsel %vm367_vm0, 0, %v366_v6  ;;  %v560_v6 = vsub.s32 0, %v1634_v4  ;;  %v1469_v4 = vmov 5  }
  0x8f   : > { %v375_v8 = vsel %vm371_vm1, %v374_v7, 0 }
  0x90   : > { %393 = vrot.lane.b32.xlu1 %v375_v8, %s1454_s24  ;;  %v380_v13 = vrot.slane %v375_v8, 4 }
  0x91   : > { %v363_v9 = vpop.permute.xlu0 %362 }
  0x92   : > { %v370_v10 = vsel %vm367_vm0, 0, %v363_v9  ;;  %vm824_vm0 = vcmask 64512  }
  0x93   : > { %v372_v11 = vsel %vm371_vm1, %v370_v10, 0 }
  0x94   : > { %391 = vrot.lane.b32.xlu1 %v372_v11, %s1454_s24  ;;  %v379_v12 = vrot.slane %v372_v11, 4 }
  0x95   : > { %v396_v16 = vpop.permute.xlu0 %395 }
  0x96   : > { %382 = vrot.lane.b32.xlu0 %v379_v12, %s1452_s19 }
  0x98   : > { %411 = vrot.lane.b32.xlu1 %v375_v8, %s1456_s26 }
  0x99   : > { %v405_v17 = vpop.permute.xlu0 %404 }
  0x9a   : > { %400 = vrot.lane.b32.xlu0 %v379_v12, %s1455_s25 }
  0x9c   : > { %409 = vrot.lane.b32.xlu1 %v372_v11, %s1456_s26 }
  0x9d   : > { %v414_v18 = vpop.permute.xlu0 %413 }
  0x9e   : > { %418 = vrot.lane.b32.xlu0 %v379_v12, %s1457_s10 }
  0xa0   : > { %429 = vrot.lane.b32.xlu1 %v375_v8, %s1458_s12 }
  0xa1   : > { %v423_v20 = vpop.permute.xlu0 %422 }
  0xa2   : > { %436 = vrot.lane.b32.xlu0 %v379_v12, %s1459_s13 }
  0xa4   : > { %427 = vrot.lane.b32.xlu1 %v372_v11, %s1458_s12 }
  0xa5   : > { %v432_v23 = vpop.permute.xlu0 %431 }
  0xa6   : > { %447 = vrot.lane.b32.xlu0 %v375_v8, %s1460_s17 }
  0xa8   : > { %384 = vrot.lane.b32.xlu1 %v380_v13, %s1452_s19 }
  0xa9   : > { %v441_v25 = vpop.permute.xlu0 %440 }
  0xaa   : > { %545 = vperm.xlu0 %1365, %v1596_v14  }
  0xac   : > { %402 = vrot.lane.b32.xlu1 %v380_v13, %s1455_s25 }
  0xb0   : > { %420 = vrot.lane.b32.xlu1 %v380_v13, %s1457_s10 }
  0xb4   : > { %438 = vrot.lane.b32.xlu1 %v380_v13, %s1459_s13 }
  0xb8   : > { %445 = vrot.lane.b32.xlu1 %v372_v11, %s1460_s17 }
  0xbc   : > { %449 = vrot.lane.b32.xlu1 %v1451_v0, %s1460_s17 }
  0xc0   : > { %551 = vperm.xlu1 %1366, %v1596_v14  }
 0x102   : > { %v394_v21 = vpop.permute.xlu1 %393 }
 0x103   : > { %v399_v37 = vsel %vm397_vm4, %v394_v21, %v396_v16 }
 0x106   : > { %v392_v22 = vpop.permute.xlu1 %391 }
 0x107   : > { %v398_v38 = vsel %vm397_vm4, %v392_v22, %v394_v21 }
 0x108   : > { %v383_v28 = vpop.permute.xlu0 %382 }
 0x10a   : > { %v412_v24 = vpop.permute.xlu1 %411 }
 0x10b   : > { %v417_v45 = vsel %vm415_vm6, %v412_v24, %v414_v18 }
 0x10c   : > { %v401_v30 = vpop.permute.xlu0 %400 }
 0x10e   : > { %v410_v26 = vpop.permute.xlu1 %409 }
 0x10f   : > { %v416_v46 = vsel %vm415_vm6, %v410_v26, %v412_v24 }
 0x110   : > { %v419_v41 = vpop.permute.xlu0 %418 }
 0x112   : > { %v430_v27 = vpop.permute.xlu1 %429 }
 0x113   : > { %v435_v53 = vsel %vm433_vm8, %v430_v27, %v432_v23 }
 0x114   : > { %v437_v51 = vpop.permute.xlu0 %436 }
 0x116   : > { %v428_v29 = vpop.permute.xlu1 %427 }
 0x117   : > { %v434_v54 = vsel %vm433_vm8, %v428_v29, %v430_v27 }
 0x118   : > { %v448_v60 = vpop.permute.xlu0 %447 }
 0x11a   : > { %v385_v31 = vpop.permute.xlu1 %384 }
 0x11b   : > { %v389_v32 = vsel %vm388_vm2, %v383_v28, %v385_v31  ;;  %v390_v33 = vsel %vm388_vm2, %v385_v31, %v387_v19 }
 0x11c   : > { %v459_v34 = vsel %vm454_vm3, %v375_v8, %v390_v33  ;;  %v456_v35 = vsel %vm454_vm3, %v372_v11, %v389_v32  ;;  %v1462_v8 = vmov 0.0  }
 0x11d   : > { %500 = vmatprep.subr.bf16.mxu0 %v459_v34  ;;  %v1204_v9 = vsel %vm350_vm12, 1.0, %v1462_v8  ;;  %v329_v34 = vld [vmem:[%s1918_s6 + $0x80] sm:$0xff] }
 0x11e   : > { %v403_v36 = vpop.permute.xlu1 %402  ;;  %501 = vmatpush1.bf16.msra.mxu0 %v456_v35  ;;  %v561_v16 = vrot.slane %v1204_v9, %v560_v6  ;;  %v330_v35 = vld [vmem:[%s1918_s6 + $0x88] sm:$0xff] }
 0x11f   : > { %v407_v39 = vsel %vm406_vm5, %v401_v30, %v403_v36  ;;  %v408_v40 = vsel %vm406_vm5, %v403_v36, %v405_v17  ;;  %v313_v36 = vld [vmem:[%s1918_s6] sm:$0xff] }
 0x120   : > { %v467_v42 = vsel %vm454_vm3, %v399_v37, %v408_v40  ;;  %v463_v43 = vsel %vm454_vm3, %v398_v38, %v407_v39  ;;  %v1464_v37 = vmov 2   ;;  %v1465_v38 = vmov 3   ;;  %v314_v40 = vld [vmem:[%s1918_s6 + $0x8] sm:$0xff] }
 0x121   : > { %502 = vmatprep.subr.bf16.mxu0 %v467_v42  ;;  %1367 = vset.pattern.permute.xlu1 %v1464_v37  ;;  %v1272_v39 = vpack.c.bf16 %v330_v35, %v329_v34  ;;  %v332_v42 = vld [vmem:[%s1918_s6 + $0x98] sm:$0xff] }
 0x122   : > { %v421_v44 = vpop.permute.xlu1 %420  ;;  %503 = vmatpush1.bf16.msra.mxu0 %v463_v43  ;;  %1368 = vset.pattern.permute.xlu0 %v1465_v38  ;;  %v1274_v43 = vpack.c.bf16 %v314_v40, %v313_v36 }
 0x123   : > { %v425_v47 = vsel %vm424_vm7, %v419_v41, %v421_v44  ;;  %v426_v48 = vsel %vm424_vm7, %v421_v44, %v423_v20  ;;  %v331_v41 = vld [vmem:[%s1918_s6 + $0x90] sm:$0xff] }
 0x124   : > { %v475_v49 = vsel %vm454_vm3, %v417_v45, %v426_v48  ;;  %v471_v50 = vsel %vm454_vm3, %v416_v46, %v425_v47  ;;  %v1276_v44 = vpack.c.bf16 %v332_v42, %v331_v41  ;;  %v315_v45 = vld [vmem:[%s1918_s6 + $0x10] sm:$0xff]  ;;  %v316_v46 = vld [vmem:[%s1918_s6 + $0x18] sm:$0xff]  ;;  %v333_v47 = vld [vmem:[%s1918_s6 + $0xa0] sm:$0xff] }
 0x125   : > { %504 = vmatprep.subr.bf16.mxu0 %v475_v49  ;;  %v334_v48 = vld [vmem:[%s1918_s6 + $0xa8] sm:$0xff]  ;;  %v1278_v49 = vpack.c.bf16 %v316_v46, %v315_v45 }
 0x126   : > { %v439_v52 = vpop.permute.xlu1 %438  ;;  %505 = vmatpush1.bf16.msra.mxu0 %v471_v50  ;;  %v1280_v50 = vpack.c.bf16 %v334_v48, %v333_v47 }
 0x127   : > { %v443_v55 = vsel %vm442_vm9, %v437_v51, %v439_v52  ;;  %v444_v56 = vsel %vm442_vm9, %v439_v52, %v441_v25  ;;  %v317_v51 = vld [vmem:[%s1918_s6 + $0x20] sm:$0xff]  ;;  %v318_v52 = vld [vmem:[%s1918_s6 + $0x28] sm:$0xff] }
 0x128   : > { %v483_v57 = vsel %vm454_vm3, %v435_v53, %v444_v56  ;;  %v479_v58 = vsel %vm454_vm3, %v434_v54, %v443_v55  ;;  %v335_v53 = vld [vmem:[%s1918_s6 + $0xb0] sm:$0xff]  ;;  %v336_v54 = vld [vmem:[%s1918_s6 + $0xb8] sm:$0xff]  ;;  %v1282_v55 = vpack.c.bf16 %v318_v52, %v317_v51 }
 0x129   : > { %506 = vmatprep.subr.bf16.mxu0 %v483_v57  ;;  %v546_v5 = vpop.permute.xlu0 %545  ;;  %v1284_v56 = vpack.c.bf16 %v336_v54, %v335_v53  ;;  %v319_v57 = vld [vmem:[%s1918_s6 + $0x30] sm:$0xff] }
 0x12a   : > { %v446_v59 = vpop.permute.xlu1 %445  ;;  %507 = vmatpush1.bf16.msra.mxu0 %v479_v58  ;;  %v320_v58 = vld [vmem:[%s1918_s6 + $0x38] sm:$0xff] }
 0x12b   : > { %v452_v61 = vsel %vm451_vm10, %v446_v59, %v448_v60  ;;  %v337_v59 = vld [vmem:[%s1918_s6 + $0xc0] sm:$0xff] }
 0x12c   : > { %v495_v0 = vsel %vm454_vm3, %v452_v61, 0  ;;  %v1286_v61 = vpack.c.bf16 %v320_v58, %v319_v57 }
 0x12e   : > { %v450_v62 = vpop.permute.xlu1 %449 }
 0x12f   : > { %v453_v63 = vsel %vm451_vm10, %v448_v60, %v450_v62  ;;  %v338_v60 = vld [vmem:[%s1918_s6 + $0xc8] sm:$0xff] }
 0x130   : > { %1208 = vmatprep.subr.msk.bf16.mxu0 %vm454_vm3, %v453_v63  ;;  %v1288_v62 = vpack.c.bf16 %v338_v60, %v337_v59  ;;  %v321_v63 = vld [vmem:[%s1918_s6 + $0x40] sm:$0xff] }
 0x131   : > { %509 = vmatpush1.bf16.msra.mxu0 %v495_v0  ;;  %v322_v0 = vld [vmem:[%s1918_s6 + $0x48] sm:$0xff] }
 0x132   : > { %1273 = vmatprep.subr.bf16.mxu0 %v1272_v39 }
 0x134   : > { %1209 = vmatmul.mubr.msk.bf16.vlgmr.msra.gmra.mrb[0].mxu0 %vm490_vm11, %v1374_v1  ;;  %v339_v1 = vld [vmem:[%s1918_s6 + $0xd0] sm:$0xff] }
 0x135   : > { %1275 = vmatpush3.bf16.msra.mxu0 %v1274_v43 }
 0x136   : > { %1277 = vmatprep.subr.bf16.mxu0 %v1276_v44 }
 0x139   : > { %1279 = vmatpush3.bf16.msra.mxu0 %v1278_v49 }
 0x13a   : > { %1281 = vmatprep.subr.bf16.mxu0 %v1280_v50 }
 0x13d   : > { %1283 = vmatpush3.bf16.msra.mxu0 %v1282_v55 }
 0x13e   : > { %1285 = vmatprep.subr.bf16.mxu0 %v1284_v56 }
 0x13f   : > { %v552_v10 = vpop.permute.xlu1 %551 }
 0x141   : > { %1287 = vmatpush3.bf16.msra.mxu0 %v1286_v61  ;;  %v310_v61 = vld [vmem:[%s1914_s2] sm:$0xf] }
 0x142   : > { %1289 = vmatprep.subr.bf16.mxu0 %v1288_v62  ;;  %v323_v62 = vld [vmem:[%s1918_s6 + $0x50] sm:$0xff] }
 0x207   : > { %v534_v7 = vpop.f32.mrb[0].mxu0 }
 0x208   : > { %v548_v11 = vmul.f32 %v546_v5, %v534_v7  ;;  %v536_v12 = vpop.f32.mrb[1].mxu0  ;;  %v1292_v7 = vpack.c.bf16 %v340_v2, %v339_v1  ;;  %v341_v1 = vld [vmem:[%s1918_s6 + $0xe0] sm:$0xff]  ;;  %v342_v2 = vld [vmem:[%s1918_s6 + $0xe8] sm:$0xff] }
 0x209   : > { %v549_v13 = vmul.f32 %v546_v5, %v536_v12  ;;  %v1639_v15 = vpop.f32.mrb[2].mxu0  ;;  %v1290_v5 = vpack.c.bf16 %v322_v0, %v321_v63  ;;  %v324_v63 = vld [vmem:[%s1918_s6 + $0x58] sm:$0xff] }
 0x20a   : > { %v554_v17 = vadd.f32 %v552_v10, %v548_v11  ;;  %v1643_v18 = vpop.f32.mrb[3].mxu0  ;;  %v1294_v0 = vpack.c.bf16 %v324_v63, %v323_v62 }
 0x20b   : > { %v555_v19 = vadd.f32 %v552_v10, %v549_v13  ;;  %1291 = vmatpush3.bf16.msra.mxu0 %v1290_v5  ;;  %v1296_v5 = vpack.c.bf16 %v342_v2, %v341_v1 }
 0x20c   : > { %v556_v20 = vmax.f32 %v554_v17, 0.0  ;;  %1293 = vmatprep.subr.bf16.mxu0 %v1292_v7  ;;  %v325_v7 = vld [vmem:[%s1918_s6 + $0x60] sm:$0xff] }
 0x20d   : > { %v557_v21 = vmax.f32 %v555_v19, 0.0 }
 0x20e   : > { %v562_v22 = vmul.f32 %v561_v16, %v556_v20 }
 0x20f   : > { %v563_v23 = vmul.f32 %v561_v16, %v557_v21  ;;  %1295 = vmatpush3.bf16.msra.mxu0 %v1294_v0 }
 0x210   : > { %v564_v24 = vpack.c.bf16 %v562_v22, %v562_v22  ;;  %1297 = vmatprep.subr.bf16.mxu0 %v1296_v5 }
 0x211   : > { %v565_v25 = vpack.c.bf16 %v563_v23, %v563_v23 }
 0x212   : > { %568 = vrot.lane.b32.xlu1 %v564_v24, %s1463_s23 }
 0x213   : > { %570 = vrot.lane.b32.xlu0 %v565_v25, %s1463_s23  ;;  %s1393_s23 = scalar_lea.vmem %s1392_s22, 512 }
 0x284   : > { %v569_v26 = vpop.permute.xlu1 %568 }
 0x285   : > { %v1645_v27 = vsel %vm572_vm13, 0, %v569_v26  ;;  %v571_v28 = vpop.permute.xlu0 %570 }
 0x286   : > { %v578_v29 = vsel %vm572_vm13, %v571_v28, 0  ;;  %592 = vrot.lane.b32.xlu0 %v1645_v27, %s1454_s24  ;;  %v1656_v30 = vsel %vm572_vm13, %v569_v26, %v571_v28  ;;  %v581_v31 = vrot.slane %v1645_v27, 4 }
 0x287   : > { %596 = vrot.lane.b32.xlu1 %v578_v29, %s1454_s24  ;;  %v583_v32 = vrot.slane %v578_v29, 4  ;;  %v582_v33 = vrot.slane %v1656_v30, 4 }
 0x28a   : > { %608 = vrot.lane.b32.xlu0 %v1645_v27, %s1456_s26 }
 0x28b   : > { %612 = vrot.lane.b32.xlu1 %v578_v29, %s1456_s26 }
 0x28e   : > { %624 = vrot.lane.b32.xlu0 %v1645_v27, %s1458_s12 }
 0x28f   : > { %628 = vrot.lane.b32.xlu1 %v578_v29, %s1458_s12 }
 0x292   : > { %594 = vrot.lane.b32.xlu0 %v1656_v30, %s1454_s24 }
 0x293   : > { %584 = vrot.lane.b32.xlu1 %v581_v31, %s1452_s19 }
 0x296   : > { %610 = vrot.lane.b32.xlu0 %v1656_v30, %s1456_s26  ;;  %s297_s26 = sand.u32 1, %s1441_s28  }
 0x297   : > { %600 = vrot.lane.b32.xlu1 %v581_v31, %s1455_s25 }
 0x29a   : > { %626 = vrot.lane.b32.xlu0 %v1656_v30, %s1458_s12  ;;  %s1222_s12 = sshll.u32 %s1540_s9, 8  ;;  %s1871_s9 = scalar_lea.sflag [#allocation3], %s297_s26 }
 0x29b   : > { %616 = vrot.lane.b32.xlu1 %v581_v31, %s1457_s10 }
 0x29e   : > { %588 = vrot.lane.b32.xlu0 %v583_v32, %s1452_s19 }
 0x29f   : > { %586 = vrot.lane.b32.xlu1 %v582_v33, %s1452_s19 }
 0x2a2   : > { %602 = vrot.lane.b32.xlu0 %v582_v33, %s1455_s25 }
 0x2a3   : > { %604 = vrot.lane.b32.xlu1 %v583_v32, %s1455_s25  ;;  %s1865_s25 = scalar_lea.hbm %s1920_s8, %s1222_s12 }
 0x2a6   : > { %618 = vrot.lane.b32.xlu0 %v582_v33, %s1457_s10 }
 0x2a7   : > { %620 = vrot.lane.b32.xlu1 %v583_v32, %s1457_s10 }
 0x2aa   : > { %634 = vrot.lane.b32.xlu0 %v582_v33, %s1459_s13 }
 0x2ab   : > { %636 = vrot.lane.b32.xlu1 %v583_v32, %s1459_s13 }
 0x2ae   : > { %640 = vrot.lane.b32.xlu0 %v1645_v27, %s1460_s17 }
 0x2af   : > { %632 = vrot.lane.b32.xlu1 %v581_v31, %s1459_s13 }
 0x2b2   : > { %644 = vrot.lane.b32.xlu0 %v578_v29, %s1460_s17 }
 0x2b3   : > { %642 = vrot.lane.b32.xlu1 %v1656_v30, %s1460_s17  ;;  %s1201_s17 = sshll.u32 %s297_s26, 4 }
 0x2b4   : > { %s299_s18 = scalar_lea.vmem [#allocation2], %s1201_s17 }
 0x2b5   : > { %s1135_s19 = sshll.u32 %s299_s18, 4  ;;  %s1867_s19 = int_to_ptr.vmem [resolvable:$true] %s1135_s19 }
 0x2b6   : > { %736 = vperm.xlu0 %1368, %v1596_v14   ;;  %s1387_s10 = scalar_lea.vmem %s1867_s19, 256  ;;  %p1394_p0 = scmp.lt.s32.totalorder %s1867_s19, %s1392_s22 }
 0x2b7   : > { %730 = vperm.xlu1 %1367, %v1596_v14   ;;  %p1388_p11 = scmp.ne.s32.totalorder %s1867_s19, %s1387_s10  ;;  %p1395_p1 = scmp.lt.s32.totalorder %s1393_s23, %s1387_s10 }
 0x2b9   : > { %p1389_p12 = pnand %p1388_p11, %p1557_p5  ;;  %p1396_p2 = por %p1395_p1, %p1394_p0 }
 0x2bb   : > { %p1390_p13 = pneg %p1389_p12 }
 0x2bd   : > { %p1397_p3 = pnand %p1396_p2, %p1390_p13 }
 0x2f8   : > { %v593_v9 = vpop.permute.xlu0 %592 }
 0x2f9   : > { %v597_v10 = vpop.permute.xlu1 %596 }
 0x2fc   : > { %v609_v11 = vpop.permute.xlu0 %608 }
 0x2fd   : > { %v613_v12 = vpop.permute.xlu1 %612 }
 0x300   : > { %v625_v13 = vpop.permute.xlu0 %624 }
 0x301   : > { %v629_v16 = vpop.permute.xlu1 %628 }
 0x304   : > { %v595_v17 = vpop.permute.xlu0 %594 }
 0x305   : > { %v585_v19 = vpop.permute.xlu1 %584  ;;  %v599_v35 = vsel %vm397_vm4, %v595_v17, %v597_v10  ;;  %v598_v37 = vsel %vm397_vm4, %v593_v9, %v595_v17  ;;  %v326_v9 = vld [vmem:[%s1918_s6 + $0x68] sm:$0xff]  ;;  %v328_v17 = vld [vmem:[%s1918_s6 + $0x78] sm:$0xff] }
 0x306   : > { %v1298_v10 = vpack.c.bf16 %v326_v9, %v325_v7 }
 0x308   : > { %v611_v20 = vpop.permute.xlu0 %610  ;;  %1299 = vmatpush3.bf16.msra.mxu0 %v1298_v10 }
 0x309   : > { %v601_v21 = vpop.permute.xlu1 %600  ;;  %v615_v41 = vsel %vm415_vm6, %v611_v20, %v613_v12  ;;  %v614_v43 = vsel %vm415_vm6, %v609_v11, %v611_v20  ;;  %v343_v11 = vld [vmem:[%s1918_s6 + $0xf0] sm:$0xff]  ;;  %v344_v12 = vld [vmem:[%s1918_s6 + $0xf8] sm:$0xff] }
 0x30c   : > { %v627_v22 = vpop.permute.xlu0 %626 }
 0x30d   : > { %v617_v23 = vpop.permute.xlu1 %616  ;;  %v631_v48 = vsel %vm433_vm8, %v627_v22, %v629_v16  ;;  %v630_v53 = vsel %vm433_vm8, %v625_v13, %v627_v22  ;;  %v327_v13 = vld [vmem:[%s1918_s6 + $0x70] sm:$0xff]  ;;  %v1300_v16 = vpack.c.bf16 %v344_v12, %v343_v11 }
 0x30f   : > { %1301 = vmatprep.subr.bf16.mxu0 %v1300_v16 }
 0x310   : > { %v589_v24 = vpop.permute.xlu0 %588 }
 0x311   : > { %v587_v25 = vpop.permute.xlu1 %586 }
 0x312   : > { %v590_v26 = vsel %vm388_vm2, %v585_v19, %v587_v25  ;;  %v591_v28 = vsel %vm388_vm2, %v587_v25, %v589_v24  ;;  %v1302_v19 = vpack.c.bf16 %v328_v17, %v327_v13  ;;  %v1205_v25 = vsel %vm353_vm14, 1.0, %v1462_v8 }
 0x313   : > { %v653_v29 = vsel %vm454_vm3, %v1656_v30, %v591_v28  ;;  %v649_v31 = vsel %vm454_vm3, %v1645_v27, %v590_v26 }
 0x314   : > { %v603_v32 = vpop.permute.xlu0 %602  ;;  %688 = vmatprep.subr.bf16.mxu1 %v653_v29  ;;  %1303 = vmatpush3.bf16.msra.mxu0 %v1302_v19 }
 0x315   : > { %v606_v33 = vsel %vm406_vm5, %v601_v21, %v603_v32  ;;  %689 = vmatpush1.bf16.msra.mxu1 %v649_v31  ;;  %v605_v34 = vpop.permute.xlu1 %604 }
 0x316   : > { %v607_v36 = vsel %vm406_vm5, %v603_v32, %v605_v34  ;;  %v657_v30 = vsel %vm454_vm3, %v598_v37, %v606_v33  ;;  %v746_v33 = vrot.slane %v1205_v25, %v560_v6  ;;  %v1467_v37 = vmov 4  }
 0x317   : > { %v661_v38 = vsel %vm454_vm3, %v599_v35, %v607_v36  ;;  %1369 = vset.pattern.permute.xlu1 %v1467_v37 }
 0x318   : > { %v619_v39 = vpop.permute.xlu0 %618  ;;  %690 = vmatprep.subr.bf16.mxu1 %v661_v38  ;;  %v1468_v38 = vmov 6   ;;  %821 = vperm.xlu1 %1369, %v1596_v14  }
 0x319   : > { %v622_v27 = vsel %vm424_vm7, %v617_v23, %v619_v39  ;;  %691 = vmatpush1.bf16.msra.mxu1 %v657_v30  ;;  %v621_v40 = vpop.permute.xlu1 %620  ;;  %1371 = vset.pattern.permute.xlu0 %v1468_v38 }
 0x31a   : > { %v623_v42 = vsel %vm424_vm7, %v619_v39, %v621_v40  ;;  %v665_v46 = vsel %vm454_vm3, %v614_v43, %v622_v27  ;;  %904 = vperm.xlu0 %1371, %v1596_v14   ;;  %v311_v40 = vld [vmem:[%s1915_s3] sm:$0xff] }
 0x31b   : > { %v669_v44 = vsel %vm454_vm3, %v615_v41, %v623_v42  ;;  %v1470_v41 = vmov 7  }
 0x31c   : > { %v635_v45 = vpop.permute.xlu0 %634  ;;  %692 = vmatprep.subr.bf16.mxu1 %v669_v44  ;;  %1370 = vset.pattern.permute.xlu1 %v1469_v4 }
 0x31d   : > { %693 = vmatpush1.bf16.msra.mxu1 %v665_v46  ;;  %v637_v47 = vpop.permute.xlu1 %636  ;;  %899 = vperm.xlu1 %1370, %v1596_v14  }
 0x31e   : > { %v639_v49 = vsel %vm442_vm9, %v635_v45, %v637_v47  ;;  %1373 = vset.pattern.permute.xlu0 %v1470_v41 }
 0x31f   : > { %v677_v50 = vsel %vm454_vm3, %v631_v48, %v639_v49 }
 0x320   : > { %v641_v51 = vpop.permute.xlu0 %640  ;;  %694 = vmatprep.subr.bf16.mxu1 %v677_v50 }
 0x321   : > { %v633_v52 = vpop.permute.xlu1 %632  ;;  %1372 = vset.pattern.permute.xlu1 %v1470_v41 }
 0x322   : > { %v638_v54 = vsel %vm442_vm9, %v633_v52, %v635_v45  ;;  %910 = vperm.xlu1 %1372, %v1596_v14   ;;  %v346_v14 = vld [vmem:[%s1919_s7 + $0x8] sm:$0xff]  ;;  %v345_v52 = vld [vmem:[%s1919_s7] sm:$0xff]  ;;  %vm1117_vm9 = vcmask 244736  }
 0x323   : > { %v673_v55 = vsel %vm454_vm3, %v630_v53, %v638_v54 }
 0x324   : > { %v645_v56 = vpop.permute.xlu0 %644  ;;  %695 = vmatpush1.bf16.msra.mxu1 %v673_v55 }
 0x325   : > { %v643_v57 = vpop.permute.xlu1 %642 }
 0x326   : > { %v646_v58 = vsel %vm451_vm10, %v641_v51, %v643_v57  ;;  %v647_v59 = vsel %vm451_vm10, %v643_v57, %v645_v56  ;;  %v312_v51 = vld [vmem:[%s1916_s4] sm:$0xff] }
 0x327   : > { %1210 = vmatprep.subr.msk.bf16.mxu1 %vm454_vm3, %v647_v59  ;;  %v683_v60 = vsel %vm454_vm3, %v646_v58, 0 }
 0x328   : > { %697 = vmatpush1.bf16.msra.mxu1 %v683_v60 }
 0x329   : > { %1262 = vmatprep.subr.mxu1 %v1462_v8 }
 0x32b   : > { %1211 = vmatmul.mubr.msk.bf16.vlgmr.msra.gmra.mrb[0].mxu1 %vm490_vm11, %v310_v61 }
 0x32c   : > { %1264 = vmatprep.mubr.msk.f32.mxu1 %vm1466_vm15, %v1462_v8 }
 0x335   : > { %v737_v22 = vpop.permute.xlu0 %736 }
 0x336   : > { %v731_v20 = vpop.permute.xlu1 %730 }
 0x397   : > { %v822_v42 = vpop.permute.xlu1 %821 }
 0x399   : > { %v905_v47 = vpop.permute.xlu0 %904 }
 0x39c   : > { %v900_v44 = vpop.permute.xlu1 %899 }
 0x3a1   : > { %v911_v53 = vpop.permute.xlu1 %910 }
 0x3fe   : > { %v722_v21 = vpop.f32.mrb[0].mxu1 }
 0x3ff   : > { %v733_v23 = vmul.f32 %v731_v20, %v722_v21  ;;  %v724_v24 = vpop.f32.mrb[1].mxu1 }
 0x400   : > { %v734_v26 = vmul.f32 %v731_v20, %v724_v24  ;;  %v726_v28 = vpop.f32.mrb[2].mxu1 }
 0x401   : > { %v1816_v29 = vadd.f32 %v737_v22, %v733_v23  ;;  %v727_v31 = vpop.f32.mrb[3].mxu1 }
 0x402   : > { %v1818_v32 = vadd.f32 %v737_v22, %v734_v26 }
 0x403   : > { %v741_v34 = vand.u32 2147483647, %v1816_v29 }
 0x404   : > { %v742_v3 = vand.u32 2147483647, %v1818_v32 }
 0x405   : > { %v747_v36 = vmul.f32 %v746_v33, %v741_v34 }
 0x406   : > { %v748_v35 = vmul.f32 %v746_v33, %v742_v3 }
 0x408   : > { %813 = vmatprep.mubr.f32.mxu0 %v748_v35 }
 0x409   : > { %814 = vmatmul.mubr.f32.vlgmr.msra.gmra.mrb[4].mxu0 %v747_v36 }
 0x4dc   : > { %v1255_v6 = vpop.f32.mrb[4].mxu0 }
 0x4dd   : > { %v1256_v39 = vpop.f32.mrb[5].mxu0 }
 0x4de   : > { %v1257_v30 = vadd.f32 %v1256_v39, %v1255_v6 }
 0x4e0   : > { %v819_v27 = vmul.f32 0.033333335, %v1257_v30 }
 0x4e2   : > { %1263 = vmatpush3.msra.mxu1 %v819_v27 }
 0x4e3   : > { %1265 = vmatmul.mubr.msk.f32.vlgmr.msra.gmra.mrb[4].mxu1 %vm824_vm0, %v311_v40  ;;  %1267 = vmatprep.subr.mxu1 %v1462_v8 }
 0x4e4   : > { %1269 = vmatprep.mubr.msk.f32.mxu1 %vm1466_vm15, %v1462_v8 }
 0x5b6   : > { %v894_v43 = vpop.f32.mrb[4].mxu1 }
 0x5b7   : > { %v895_v45 = vadd.f32 %v894_v43, %v822_v42  ;;  %v1266_v46 = vpop.f32.mrb[5].mxu1 }
 0x5b9   : > { %v902_v48 = vmul.f32 %v900_v44, %v895_v45 }
 0x5bb   : > { %v907_v49 = vadd.f32 %v905_v47, %v902_v48 }
 0x5bd   : > { %v908_v50 = vmax.f32 %v907_v49, 0.0 }
 0x5bf   : > { %1268 = vmatpush3.msra.mxu1 %v908_v50 }
 0x5c0   : > { %1270 = vmatmul.mubr.msk.f32.vlgmr.msra.gmra.mrb[6].mxu1 %vm824_vm0, %v312_v51  ;;  %996 = vmatprep.subr.mxu1 %v346_v14 }
 0x5c1   : > { %1060 = vmatprep.mubr.f32.mxu1 %v1462_v8  ;;  %997 = vmatpush1.msra.mxu1 %v345_v52 }
 0x693   : > { %v982_v54 = vpop.f32.mrb[6].mxu1 }
 0x694   : > { %v983_v55 = vadd.f32 %v982_v54, %v911_v53  ;;  %v1271_v56 = vpop.f32.mrb[7].mxu1 }
 0x696   : > { %v1214_v57 = vmul.f32 -1.442695, %v983_v55 }
 0x698   : > { %1375 = vpow2.f32 %v1214_v57 }
 0x6a2   : > { %v1376_v58 = vpop.eup %1375 }
 0x6a3   : > { %v989_v59 = vadd.f32 1.0, %v1376_v58 }
 0x6a5   : > { %1377 = vrcp.f32 %v989_v59 }
 0x6af   : > { %v1378_v8 = vpop.eup %1377 }
 0x6b0   : > { %v992_v60 = vmul.f32 %v1378_v8, %v819_v27 }
 0x6b2   : > { %1215 = vmatmul.mubr.msk.f32.vlgmr.msra.gmra.mrb[8].mxu1 %vm824_vm0, %v992_v60 }
 0x785   : > { %v1062_v61 = vpop.f32.mrb[8].mxu1 }
 0x786   : > { %v1067_v62 = vsub.f32 %v1816_v29, %v1062_v61  ;;  %v1087_v63 = vadd.f32 %v1062_v61, %v1816_v29  ;;  %v1064_v0 = vpop.f32.mrb[9].mxu1 }
 0x787   : > { %v1068_v1 = vsub.f32 %v1818_v32, %v1064_v0  ;;  %v1088_v2 = vadd.f32 %v1064_v0, %v1818_v32 }
 0x788   : > { %v1069_v5 = vmul.f32 %v1067_v62, %v1067_v62  ;;  %v1089_v7 = vmul.f32 %v1087_v63, %v1087_v63 }
 0x789   : > { %v1070_v9 = vmul.f32 %v1068_v1, %v1068_v1  ;;  %v1090_v10 = vmul.f32 %v1088_v2, %v1088_v2 }
 0x78a   : > { %v1071_v11 = vadd.f32 0.003, %v1069_v5  ;;  %v1091_v12 = vadd.f32 0.003, %v1089_v7 }
 0x78b   : > { %v1072_v13 = vadd.f32 0.003, %v1070_v9  ;;  %v1092_v16 = vadd.f32 0.003, %v1090_v10 }
 0x78c   : > { %1379 = vrsqrt.f32 %v1071_v11  ;;  %vm1075_vm1 = vcmp.eq.f32.partialorder %v1071_v11, inf  ;;  %vm1077_vm2 = vcmp.eq.f32.partialorder %v1071_v11, 0.0  ;;  %v1078_v21 = vand.u32 2147483648, %v1071_v11 }
 0x78d   : > { %1381 = vrsqrt.f32 %v1091_v12  ;;  %vm1095_vm3 = vcmp.eq.f32.partialorder %v1091_v12, inf  ;;  %vm1097_vm4 = vcmp.eq.f32.partialorder %v1091_v12, 0.0  ;;  %v1098_v24 = vand.u32 2147483648, %v1091_v12 }
 0x78e   : > { %1383 = vrsqrt.f32 %v1072_v13  ;;  %vm1082_vm5 = vcmp.eq.f32.partialorder %v1072_v13, inf  ;;  %vm1084_vm6 = vcmp.eq.f32.partialorder %v1072_v13, 0.0  ;;  %v1085_v33 = vand.u32 2147483648, %v1072_v13 }
 0x78f   : > { %1385 = vrsqrt.f32 %v1092_v16  ;;  %vm1102_vm7 = vcmp.eq.f32.partialorder %v1092_v16, inf  ;;  %v1105_v36 = vand.u32 2147483648, %v1092_v16  ;;  %vm1104_vm8 = vcmp.eq.f32.partialorder %v1092_v16, 0.0 }
 0x796   : > { %v1380_v17 = vpop.eup %1379 }
 0x797   : > { %v1382_v19 = vpop.eup %1381  ;;  %v1074_v20 = vmul.f32 %v1380_v17, %v1071_v11 }
 0x798   : > { %v1384_v22 = vpop.eup %1383  ;;  %v1094_v23 = vmul.f32 %v1382_v19, %v1091_v12 }
 0x799   : > { %v1386_v25 = vpop.eup %1385  ;;  %v1076_v26 = vsel %vm1075_vm1, %v1071_v11, %v1074_v20  ;;  %v1081_v28 = vmul.f32 %v1384_v22, %v1072_v13 }
 0x79a   : > { %v1096_v31 = vsel %vm1095_vm3, %v1091_v12, %v1094_v23  ;;  %v1101_v34 = vmul.f32 %v1386_v25, %v1092_v16  ;;  %v1079_v3 = vsel %vm1077_vm2, %v1078_v21, %v1076_v26 }
 0x79b   : > { %v1083_v35 = vsel %vm1082_vm5, %v1072_v13, %v1081_v28  ;;  %v1099_v37 = vsel %vm1097_vm4, %v1098_v24, %v1096_v31 }
 0x79c   : > { %v1086_v38 = vsel %vm1084_vm6, %v1085_v33, %v1083_v35  ;;  %v1103_v4 = vsel %vm1102_vm7, %v1092_v16, %v1101_v34  ;;  %v1107_v6 = vsub.f32 %v1079_v3, %v1099_v37 }
 0x79d   : > { %v1106_v39 = vsel %vm1104_vm8, %v1105_v36, %v1103_v4 }
 0x79e   : > { %v1108_v30 = vsub.f32 %v1086_v38, %v1106_v39  ;;  %v1109_v27 = vmul.f32 0.5, %v1107_v6 }
 0x7a0   : > { %v1110_v40 = vmul.f32 0.5, %v1108_v30  ;;  %v1111_v41 = vadd.f32 %v1109_v27, %v1816_v29 }
 0x7a2   : > { %v1112_v42 = vadd.f32 %v1110_v40, %v1818_v32  ;;  %v1113_v43 = vadd.f32 %v1111_v41, %v1639_v15 }
 0x7a4   : > { %v1114_v44 = vadd.f32 %v1112_v42, %v1643_v18  ;;  %v1115_v45 = vmax.f32 %v1113_v43, 0.0 }
 0x7a6   : > { %v1116_v29 = vmax.f32 %v1114_v44, 0.0  ;;  %1118 = vst.msk [vmem:[%s299_s18] sm:$0xff] %vm1117_vm9, %v1115_v45 }
 0x7a8   : > { %1216 = vst.msk [vmem:[%s299_s18 + $0x8] sm:$0xff] %vm1117_vm9, %v1116_v29 }
 0x7a9   : > { %1400 = shalt.err (!%p1397_p3)
}
 0x7aa   : > { %s1401_s24 = scalar_lea.hbm %s1865_s25, 256  ;;  %s1405_s12 = scalar_lea.hbm %s1920_s8, 512 }
 0x7ab   : > { %p1402_p4 = scmp.ne.s32.totalorder %s1865_s25, %s1401_s24  ;;  %p1406_p9 = scmp.lt.u32.totalorder %s1865_s25, %s1920_s8 }
 0x7ac   : > { %p1407_p10 = scmp.lt.u32.totalorder %s1405_s12, %s1401_s24  ;;  %p1409_p12 = scmp.lt.u32.totalorder %s1401_s24, %s1865_s25 }
 0x7ad   : > { %p1403_p7 = pnand %p1402_p4, %p1557_p5 }
 0x7ae   : > { %p1408_p11 = por %p1407_p10, %p1406_p9 }
 0x7af   : > { %p1404_p8 = pneg %p1403_p7 }
 0x7b0   : > { %p1410_p13 = por %p1409_p12, %p1408_p11 }
 0x7b2   : > { %p1411_p0 = pnand %p1410_p13, %p1404_p8 }
 0x7b4   : > { %1414 = shalt.err (!%p1411_p0)
}
 0x7b5   : > { %s1472_s13 = smov 128   ;;  %s1473_s10 = smov 8  }
 0x7b6   : > { %1304 = dma.vmem_to_hbm [thread:$0]  (%p1557_p5), %s1867_s19, 256, %s1865_s25, %s1871_s9, %s1472_s13, %s1472_s13, %s1473_s10  }
 0x7b7 PF: > { %p1310_p1 = scmp.ge.s32.totalorder %s1449_s30, 2  ;;  %s1150_s21 = sand.u32 1, %s1437_s27  }
 0x7b8   : > { %s1151_s22 = scalar_lea.sflag [#allocation3], %s1150_s21 }
 0x7b9   : > { %p1307_p2 = pnand %p1310_p1, %p1561_p6 }
 0x7bb   : > { %1432 = dma.done.wait (!%p1307_p2), %s1151_s22, 256  }
 0x7bc   : > { %1434 = vsyncadd (!%p1307_p2), %s1151_s22, 4294967040  ;;  %p18_p3 = scmp.ge.s32.totalorder %s1544_s11, 4   ;;  %s1923_s27 = smov %s1441_s28 }
 0x7bd   : > { %s1924_s28 = smov %s1445_s29  ;;  %s1925_s29 = smov %s1555_s14 }
 0x7be   : > { %s1926_s30 = smov %s1544_s11  ;;  %20 = sbr.rel (!%p18_p3) target bundleno = 3 (0x3), region = 89 }
 0x7c5   :  { %1156 = vsyncpa [#allocation3], 1 }
 0x7c6   :  { %1158 = vsyncpa [#allocation3 + $0x1], 1 }

</bundles_post_ra>
